<compile_context>
chip_gen: v6e
topology: v6e:2x2x1
jax: 0.10.0
libtpu: 0.0.40
codegen_flags: <defaults>
</compile_context>

<pallas_src>
import jax
import jax.numpy as jnp
from jax.experimental import pallas as pl
from jax.experimental.pallas import tpu as pltpu


def _round_up(x: int, m: int) -> int:
    return ((x + m - 1) // m) * m


# --------------------------------------------------------------------------
# Kernel
# --------------------------------------------------------------------------
def autoencoder_kernel(x_ref, w1_ref, b1_ref, w2_ref, b2_ref, o_ref):
    # Encoder: h = relu(x @ W1 + b1); bf16 MXU inputs, f32 accumulation.
    h = jnp.dot(x_ref[...], w1_ref[...], preferred_element_type=jnp.float32)
    h = jnp.maximum(h + b1_ref[...], 0.0)                 # b1 (1, Hp) broadcasts

    # Decoder: y = sigmoid(h @ W2 + b2); h recast to bf16 only for the MXU.
    y = jnp.dot(h.astype(jnp.bfloat16), w2_ref[...],
                preferred_element_type=jnp.float32)
    z = y + b2_ref[...]
    # sigmoid(z) = 1 / (1 + exp(-z)); exp + reciprocal both go to the EUP slot.
    sig = pl.reciprocal(1.0 + jnp.exp(-z), approx=True)
    o_ref[...] = sig.astype(o_ref.dtype)


# --------------------------------------------------------------------------
# One-time parameter preparation (pad to 128-lane multiples, cast to bf16).
# Do this once per set of weights and reuse the result across forward calls.
# --------------------------------------------------------------------------
def prepare_params(w1, b1, w2, b2):
    """w1: (K, H); b1: (1, H) or (H,); w2: (H, N); b2: (1, N) or (N,)."""
    K, H = w1.shape
    N = w2.shape[-1]
    K_p, H_p, N_p = _round_up(K, 128), _round_up(H, 128), _round_up(N, 128)

    # Zero padding is inert: extra hidden units are relu(0)=0 and feed
    # zero-padded W2 rows; extra output columns are sliced off in forward().
    w1_p = jnp.zeros((K_p, H_p), jnp.bfloat16).at[:K, :H].set(
        w1.astype(jnp.bfloat16))
    b1_p = jnp.zeros((1, H_p), jnp.float32).at[:, :H].set(
        jnp.asarray(b1, jnp.float32).reshape(1, H))
    w2_p = jnp.zeros((H_p, N_p), jnp.bfloat16).at[:H, :N].set(
        w2.astype(jnp.bfloat16))
    b2_p = jnp.zeros((1, N_p), jnp.float32).at[:, :N].set(
        jnp.asarray(b2, jnp.float32).reshape(1, N))

    return {"w1": w1_p, "b1": b1_p, "w2": w2_p, "b2": b2_p,
            "dims": (K, H, N)}


# --------------------------------------------------------------------------
# Tile / VMEM budgeting
# --------------------------------------------------------------------------
def _choose_tile_b(B, K_p, N_p, max_tile_b):
    # Pipelined per-row bytes: x tile (bf16, double-buffered) + out tile
    # (f32, double-buffered).
    per_row = 2 * K_p * 2 + 2 * N_p * 4
    budget = 12 << 20                       # fits v5e's 16 MiB scoped default
    cap = max(16, (budget // per_row) // 16 * 16)
    tile_b = min(max_tile_b, cap)
    if B <= tile_b:
        if B > 16:
            # Aim for >=2 grid steps so the parallel batch axis can use both
            # TensorCores on v7x (harmless elsewhere).
            tile_b = max(16, _round_up(-(-B // 2), 16))
        else:
            tile_b = _round_up(max(B, 1), 16)
    return tile_b


# --------------------------------------------------------------------------
# Forward
# --------------------------------------------------------------------------
def autoencoder_forward(x, params, *, max_tile_b: int = 512):
    """x: (B, K) f32; params: output of prepare_params()."""
    w1_p, b1_p, w2_p, b2_p = params["w1"], params["b1"], params["w2"], params["b2"]
    K, H, N = params["dims"]
    B, K_in = x.shape
    assert K_in == K, f"x feature dim {K_in} != weight input dim {K}"

    K_p, H_p = w1_p.shape
    N_p = w2_p.shape[1]

    tile_b = _choose_tile_b(B, K_p, N_p, max_tile_b)
    B_p = _round_up(B, tile_b)

    # Only x is (re)padded per call; weights/biases are already padded.
    x_p = jnp.zeros((B_p, K_p), jnp.bfloat16).at[:B, :K].set(
        x.astype(jnp.bfloat16))

    grid = (B_p // tile_b,)

    # Explicit VMEM budget: x/out double-buffered, weights single-buffered.
    x_bytes = 2 * tile_b * K_p * 2
    out_bytes = 2 * tile_b * N_p * 4
    w_bytes = (K_p * H_p + H_p * N_p) * 2 + (H_p + N_p) * 4
    vmem_limit = int(min(64 << 20, max(16 << 20, 2 * (x_bytes + out_bytes + w_bytes))))

    out_padded = pl.pallas_call(
        autoencoder_kernel,
        out_shape=jax.ShapeDtypeStruct((B_p, N_p), jnp.float32),
        grid_spec=pltpu.PrefetchScalarGridSpec(
            num_scalar_prefetch=0,
            grid=grid,
            in_specs=[
                # Batch tile of x moves per grid step (auto double-buffered).
                pl.BlockSpec((tile_b, K_p), lambda i: (i, 0)),
                # Weights/biases: constant index_map -> VMEM-resident; the
                # block never changes, so single-buffer it.
                pl.BlockSpec((K_p, H_p), lambda i: (0, 0),
                             pipeline_mode=pl.Buffered(1)),
                pl.BlockSpec((1, H_p), lambda i: (0, 0),
                             pipeline_mode=pl.Buffered(1)),
                pl.BlockSpec((H_p, N_p), lambda i: (0, 0),
                             pipeline_mode=pl.Buffered(1)),
                pl.BlockSpec((1, N_p), lambda i: (0, 0),
                             pipeline_mode=pl.Buffered(1)),
            ],
            out_specs=pl.BlockSpec((tile_b, N_p), lambda i: (i, 0)),
        ),
        compiler_params=pltpu.CompilerParams(
            dimension_semantics=("parallel",),
            vmem_limit_bytes=vmem_limit,
        ),
    )(x_p, w1_p, b1_p, w2_p, b2_p)

    # Padded batch rows / output columns are garbage by construction -> slice.
    return out_padded[:B, :N]


# --------------------------------------------------------------------------
# Self-test
# --------------------------------------------------------------------------
if __name__ == "__main__":
    # Shapes implied by AutoEncoder(input_size, hidden_size, output_size).
    batch = 8
    input_size = 64
    hidden_size = 32
    output_size = 64

    key = jax.random.PRNGKey(0)
    kx, kw1, kb1, kw2, kb2 = jax.random.split(key, 5)

    x = jax.random.normal(kx, (batch, input_size), dtype=jnp.float32)

    # Deterministic synthetic parameters (not a checkpoint load).
    w1 = jax.random.normal(kw1, (input_size, hidden_size), dtype=jnp.float32) * 0.1
    b1 = jax.random.normal(kb1, (1, hidden_size), dtype=jnp.float32) * 0.1
    w2 = jax.random.normal(kw2, (hidden_size, output_size), dtype=jnp.float32) * 0.1
    b2 = jax.random.normal(kb2, (1, output_size), dtype=jnp.float32) * 0.1

    # Pad/cast parameters once; reuse across calls.
    params = prepare_params(w1, b1, w2, b2)
    params = jax.tree_util.tree_map(
        lambda a: jax.block_until_ready(a) if isinstance(a, jax.Array) else a,
        params)

    out = autoencoder_forward(x, params)
    jax.block_until_ready(out)

    # Pure-JAX f32 reference (same semantics as the PyTorch forward).
    h_ref = jnp.maximum(x @ w1 + b1, 0.0)
    y_ref = jax.nn.sigmoid(h_ref @ w2 + b2)

    assert out.shape == (batch, output_size)
    # bf16 matmul inputs + approx reciprocal -> looser tolerance than pure f32.
    assert jnp.allclose(out, y_ref, atol=2e-2, rtol=2e-2), (
        float(jnp.max(jnp.abs(out - y_ref))))

    print("KERNEL_OK")
</pallas_src>

<mosaic_0001>
module attributes {stable_mosaic.version = 11 : i64} {
  func.func @autoencoder_kernel(%arg0: i32, %arg1: memref<16x128xbf16, #tpu.memory_space<vmem>>, %arg2: memref<128x128xbf16, #tpu.memory_space<vmem>>, %arg3: memref<1x128xf32, #tpu.memory_space<vmem>>, %arg4: memref<128x128xbf16, #tpu.memory_space<vmem>>, %arg5: memref<1x128xf32, #tpu.memory_space<vmem>>, %arg6: memref<16x128xf32, #tpu.memory_space<vmem>>) attributes {dimension_semantics = [#tpu.dimension_semantics<parallel>], iteration_bounds = array<i64: 1>, scalar_prefetch = 0 : i64, scratch_operands = 0 : i64, tpu.core_type = #tpu.core_type<tc>, window_params = [{transform_indices = @transform_0, window_bounds = array<i64: 16, 128>}, {pipeline_mode = #tpu.pipeline_mode<synchronous>, transform_indices = @transform_1, window_bounds = array<i64: 128, 128>}, {pipeline_mode = #tpu.pipeline_mode<synchronous>, transform_indices = @transform_2, window_bounds = array<i64: 1, 128>}, {pipeline_mode = #tpu.pipeline_mode<synchronous>, transform_indices = @transform_3, window_bounds = array<i64: 128, 128>}, {pipeline_mode = #tpu.pipeline_mode<synchronous>, transform_indices = @transform_4, window_bounds = array<i64: 1, 128>}, {transform_indices = @transform_5, window_bounds = array<i64: 16, 128>}]} {
    %c0 = arith.constant 0 : index
    %c0_0 = arith.constant 0 : index
    %0 = vector.load %arg1[%c0, %c0_0] : memref<16x128xbf16, #tpu.memory_space<vmem>>, vector<16x128xbf16>
    %c0_1 = arith.constant 0 : index
    %c0_2 = arith.constant 0 : index
    %1 = vector.load %arg2[%c0_1, %c0_2] : memref<128x128xbf16, #tpu.memory_space<vmem>>, vector<128x128xbf16>
    %cst = arith.constant dense<0.000000e+00> : vector<16x128xf32>
    %2 = tpu.matmul %0, %1, %cst {dimension_numbers = #tpu.dot_dimension_numbers<[1], [0], [0], [1], [0, 0, 1, 1], [], []>} : vector<16x128xbf16>, vector<128x128xbf16>, vector<16x128xf32> -> vector<16x128xf32>
    %c0_3 = arith.constant 0 : index
    %c0_4 = arith.constant 0 : index
    %3 = vector.load %arg3[%c0_3, %c0_4] : memref<1x128xf32, #tpu.memory_space<vmem>>, vector<1x128xf32>
    %4 = vector.broadcast %3 : vector<1x128xf32> to vector<16x128xf32>
    %5 = arith.addf %2, %4 : vector<16x128xf32>
    %cst_5 = arith.constant 0.000000e+00 : f32
    %6 = vector.broadcast %cst_5 : f32 to vector<16x128xf32>
    %7 = arith.maximumf %5, %6 : vector<16x128xf32>
    %8 = arith.truncf %7 : vector<16x128xf32> to vector<16x128xbf16>
    %c0_6 = arith.constant 0 : index
    %c0_7 = arith.constant 0 : index
    %9 = vector.load %arg4[%c0_6, %c0_7] : memref<128x128xbf16, #tpu.memory_space<vmem>>, vector<128x128xbf16>
    %cst_8 = arith.constant dense<0.000000e+00> : vector<16x128xf32>
    %10 = tpu.matmul %8, %9, %cst_8 {dimension_numbers = #tpu.dot_dimension_numbers<[1], [0], [0], [1], [0, 0, 1, 1], [], []>} : vector<16x128xbf16>, vector<128x128xbf16>, vector<16x128xf32> -> vector<16x128xf32>
    %c0_9 = arith.constant 0 : index
    %c0_10 = arith.constant 0 : index
    %11 = vector.load %arg5[%c0_9, %c0_10] : memref<1x128xf32, #tpu.memory_space<vmem>>, vector<1x128xf32>
    %12 = vector.broadcast %11 : vector<1x128xf32> to vector<16x128xf32>
    %13 = arith.addf %10, %12 : vector<16x128xf32>
    %cst_11 = arith.constant 0.000000e+00 : f32
    %14 = vector.broadcast %cst_11 : f32 to vector<16x128xf32>
    %15 = arith.subf %14, %13 : vector<16x128xf32>
    %16 = math.exp %15 : vector<16x128xf32>
    %cst_12 = arith.constant 1.000000e+00 : f32
    %17 = vector.broadcast %cst_12 : f32 to vector<16x128xf32>
    %18 = arith.addf %17, %16 : vector<16x128xf32>
    %19 = tpu.reciprocal %18 {approx = true} : vector<16x128xf32> -> vector<16x128xf32>
    %c0_13 = arith.constant 0 : index
    %c0_14 = arith.constant 0 : index
    %20 = vector.load %arg6[%c0_13, %c0_14] : memref<16x128xf32, #tpu.memory_space<vmem>>, vector<16x128xf32>
    tpu.vector_store %arg6[%c0_13, %c0_14], %19 {strides = array<i32>} : memref<16x128xf32, #tpu.memory_space<vmem>>, vector<16x128xf32>,
    return
  }
  func.func @transform_0(%arg0: i32) -> (i32, i32) {
    %c0_i32 = arith.constant 0 : i32
    %c0_i32_0 = arith.constant 0 : i32
    return %arg0, %c0_i32 : i32, i32
  }
  func.func @transform_1(%arg0: i32) -> (i32, i32) {
    %c0_i32 = arith.constant 0 : i32
    %c0_i32_0 = arith.constant 0 : i32
    %c0_i32_1 = arith.constant 0 : i32
    return %c0_i32, %c0_i32_0 : i32, i32
  }
  func.func @transform_2(%arg0: i32) -> (i32, i32) {
    %c0_i32 = arith.constant 0 : i32
    %c0_i32_0 = arith.constant 0 : i32
    %c0_i32_1 = arith.constant 0 : i32
    return %c0_i32, %c0_i32_0 : i32, i32
  }
  func.func @transform_3(%arg0: i32) -> (i32, i32) {
    %c0_i32 = arith.constant 0 : i32
    %c0_i32_0 = arith.constant 0 : i32
    %c0_i32_1 = arith.constant 0 : i32
    return %c0_i32, %c0_i32_0 : i32, i32
  }
  func.func @transform_4(%arg0: i32) -> (i32, i32) {
    %c0_i32 = arith.constant 0 : i32
    %c0_i32_0 = arith.constant 0 : i32
    %c0_i32_1 = arith.constant 0 : i32
    return %c0_i32, %c0_i32_0 : i32, i32
  }
  func.func @transform_5(%arg0: i32) -> (i32, i32) {
    %c0_i32 = arith.constant 0 : i32
    %c0_i32_0 = arith.constant 0 : i32
    return %arg0, %c0_i32 : i32, i32
  }
}

</mosaic_0001>

<bundles_post_ra>
// kernel: tpu_custom_call.1
= control target key start
LH: loop header
LB: loop body
LE: loop exit
PB: predicated region body
PF: predicated region fallthrough
CT: control target
= control target key end

     0   :  { %10 = vsyncpa [#allocation3], 0  ;;  %s584_s0 = inlined_call_operand.hbm [shape: bf16[16,128], index: 0, kind: input, shape index: {}]   ;;  %s585_s1 = inlined_call_operand.hbm [shape: bf16[128,128], index: 1, kind: input, shape index: {}]   ;;  %s586_s2 = inlined_call_operand.vmem [shape: f32[1,128], index: 2, kind: input, shape index: {}]   ;;  %s587_s3 = inlined_call_operand.hbm [shape: bf16[128,128], index: 3, kind: input, shape index: {}]   ;;  %s588_s4 = inlined_call_operand.vmem [shape: f32[1,128], index: 4, kind: input, shape index: {}]   ;;  %s589_s5 = inlined_call_operand.hbm [shape: f32[16,128], index: 5, kind: output, shape index: {}]  }
   0x1   :  { %11 = vsyncpa [#allocation6], 0 }
   0x2   :  { %12 = vsyncpa [#allocation4], 0  ;;  %s526_s18 = smov [#allocation5]   ;;  %s527_s20 = smov [#allocation2]  }
   0x3   :  { %s30_s19 = sshll.u32 %s526_s18, 4  ;;  %s18_s21 = sshll.u32 %s527_s20, 4  ;;  %s31_s19 = int_to_ptr.vmem [resolvable:$true] %s30_s19  ;;  %s19_s21 = int_to_ptr.vmem [resolvable:$true] %s18_s21 }
   0x4   :  { %s448_s22 = scalar_lea.vmem %s31_s19, 1024  ;;  %p453_p1 = scmp.lt.s32.totalorder %s31_s19, %s31_s19 }
   0x5   :  { %p449_p0 = scmp.ne.s32.totalorder %s31_s19, %s448_s22  ;;  %p454_p2 = scmp.lt.s32.totalorder %s448_s22, %s448_s22 }
   0x7   :  { %p455_p3 = por %p454_p2, %p453_p1 }
   0x9   :  { %p456_p4 = pnand %p455_p3, %p449_p0 }
   0xb   :  { %459 = shalt.err (!%p456_p4)
}
   0xc   :  { %s528_s23 = smov 64   ;;  %s529_s24 = smov 4  }
   0xd   :  { %36 = dma.hbm_to_vmem [thread:$0]  %s585_s1, 1024, %s31_s19, [#allocation6], %s528_s23, %s528_s23, %s529_s24  }
   0xe   :  { %s468_s27 = scalar_lea.vmem %s19_s21, 128  ;;  %p473_p6 = scmp.lt.s32.totalorder %s19_s21, %s19_s21 }
   0xf   :  { %p469_p5 = scmp.ne.s32.totalorder %s19_s21, %s468_s27  ;;  %p474_p7 = scmp.lt.s32.totalorder %s468_s27, %s468_s27 }
  0x11   :  { %p475_p8 = por %p474_p7, %p473_p6 }
  0x13   :  { %p476_p9 = pnand %p475_p8, %p469_p5 }
  0x15   :  { %479 = shalt.err (!%p476_p9)
}
  0x16   :  { %24 = dma.hbm_to_vmem [thread:$0]  %s584_s0, 128, %s19_s21, [#allocation3], %s528_s23, %s528_s23, %s529_s24  }
  0x17   :  { %s530_s30 = smov [#allocation7]  }
  0x18   :  { %s44_s6 = sshll.u32 %s530_s30, 4  ;;  %s45_s6 = int_to_ptr.vmem [resolvable:$true] %s44_s6 }
  0x19   :  { %s488_s7 = scalar_lea.vmem %s45_s6, 1024  ;;  %p493_p11 = scmp.lt.s32.totalorder %s45_s6, %s45_s6 }
  0x1a   :  { %p489_p10 = scmp.ne.s32.totalorder %s45_s6, %s488_s7  ;;  %p494_p12 = scmp.lt.s32.totalorder %s488_s7, %s488_s7 }
  0x1c   :  { %p495_p13 = por %p494_p12, %p493_p11 }
  0x1e   :  { %p496_p0 = pnand %p495_p13, %p489_p10 }
  0x20   :  { %499 = shalt.err (!%p496_p0)
}
  0x21   :  { %50 = dma.hbm_to_vmem [thread:$0]  %s587_s3, 1024, %s45_s6, [#allocation6], %s528_s23, %s528_s23, %s529_s24  }
  0x22   :  { %520 = dma.done.wait [#allocation3], 128  }
  0x23   :  { %521 = vsyncadd [#allocation3], 4294967168 }
  0x24   :  { %522 = dma.done.wait [#allocation6], 2048  }
  0x25   :  { %523 = vsyncadd [#allocation6], 4294965248  ;;  %v531_v0 = vmov 0.0   ;;  %vm532_vm0 = vmmov 0   ;;  %v415_v1 = vld [vmem:[#allocation5 + $0x38] sm:$0xff]   ;;  %v416_v2 = vld [vmem:[#allocation5 + $0x30] sm:$0xff]  }
  0x26   :  { %365 = vmatprep.subr.bf16.mxu0 %v531_v0  ;;  %381 = vmatprep.mubr.msk.bf16.mxu0 %vm532_vm0, %v531_v0  ;;  %v417_v3 = vld [vmem:[#allocation5 + $0x28] sm:$0xff]   ;;  %v424_v4 = vld [vmem:[#allocation7 + $0x38] sm:$0xff]   ;;  %v418_v5 = vld [vmem:[#allocation5 + $0x20] sm:$0xff]  }
  0x27   :  { %385 = vmatprep.subr.bf16.mxu1 %v531_v0  ;;  %401 = vmatprep.mubr.msk.bf16.mxu1 %vm532_vm0, %v531_v0  ;;  %v425_v6 = vld [vmem:[#allocation7 + $0x30] sm:$0xff]   ;;  %v419_v7 = vld [vmem:[#allocation5 + $0x18] sm:$0xff]   ;;  %v426_v8 = vld [vmem:[#allocation7 + $0x28] sm:$0xff]  }
  0x28   :  { %366 = vmatpush3.bf16.msra.mxu0 %v415_v1  ;;  %386 = vmatpush3.bf16.msra.mxu1 %v424_v4  ;;  %v420_v9 = vld [vmem:[#allocation5 + $0x10] sm:$0xff]   ;;  %v427_v10 = vld [vmem:[#allocation7 + $0x20] sm:$0xff]   ;;  %v421_v11 = vld [vmem:[#allocation5 + $0x8] sm:$0xff]  }
  0x29   :  { %367 = vmatprep.subr.bf16.mxu0 %v531_v0  ;;  %387 = vmatprep.subr.bf16.mxu1 %v531_v0  ;;  %v428_v12 = vld [vmem:[#allocation7 + $0x18] sm:$0xff]   ;;  %v422_v13 = vld [vmem:[#allocation5] sm:$0xff]   ;;  %v429_v15 = vld [vmem:[#allocation7 + $0x10] sm:$0xff]  }
  0x2a   :  { %v423_v14 = vld [vmem:[#allocation2] sm:$0xff]   ;;  %v430_v16 = vld [vmem:[#allocation7 + $0x8] sm:$0xff]   ;;  %v431_v17 = vld [vmem:[#allocation7] sm:$0xff]  }
  0x2b   :  { %v328_v18 = vld [vmem:[%s586_s2] ss:$0 sm:$0xff]  ;;  %s533_s2 = smov [#allocation8]  }
  0x2c   :  { %368 = vmatpush3.bf16.msra.mxu0 %v416_v2  ;;  %388 = vmatpush3.bf16.msra.mxu1 %v425_v6  ;;  %v338_v28 = vld [vmem:[%s588_s4] ss:$0 sm:$0xff]  ;;  %s315_s4 = sshll.u32 %s533_s2, 4  ;;  %s316_s4 = int_to_ptr.vmem [resolvable:$true] %s315_s4 }
  0x2d   :  { %369 = vmatprep.subr.bf16.mxu0 %v531_v0  ;;  %389 = vmatprep.subr.bf16.mxu1 %v531_v0  ;;  %s500_s11 = scalar_lea.vmem %s316_s4, 256  ;;  %p505_p2 = scmp.lt.s32.totalorder %s316_s4, %s316_s4 }
  0x2e   :  { %p501_p1 = scmp.ne.s32.totalorder %s316_s4, %s500_s11  ;;  %p506_p3 = scmp.lt.s32.totalorder %s500_s11, %s500_s11 }
  0x30   :  { %370 = vmatpush3.bf16.msra.mxu0 %v417_v3  ;;  %390 = vmatpush3.bf16.msra.mxu1 %v426_v8  ;;  %p507_p4 = por %p506_p3, %p505_p2 }
  0x31   :  { %371 = vmatprep.subr.bf16.mxu0 %v531_v0  ;;  %391 = vmatprep.subr.bf16.mxu1 %v531_v0 }
  0x32   :  { %p508_p5 = pnand %p507_p4, %p501_p1 }
  0x34   :  { %372 = vmatpush3.bf16.msra.mxu0 %v418_v5  ;;  %392 = vmatpush3.bf16.msra.mxu1 %v427_v10 }
  0x35   :  { %373 = vmatprep.subr.bf16.mxu0 %v531_v0  ;;  %393 = vmatprep.subr.bf16.mxu1 %v531_v0 }
  0x38   :  { %374 = vmatpush3.bf16.msra.mxu0 %v419_v7  ;;  %394 = vmatpush3.bf16.msra.mxu1 %v428_v12 }
  0x39   :  { %375 = vmatprep.subr.bf16.mxu0 %v531_v0  ;;  %395 = vmatprep.subr.bf16.mxu1 %v531_v0 }
  0x3c   :  { %376 = vmatpush3.bf16.msra.mxu0 %v420_v9  ;;  %396 = vmatpush3.bf16.msra.mxu1 %v429_v15 }
  0x3d   :  { %377 = vmatprep.subr.bf16.mxu0 %v531_v0  ;;  %397 = vmatprep.subr.bf16.mxu1 %v531_v0 }
  0x40   :  { %378 = vmatpush3.bf16.msra.mxu0 %v421_v11  ;;  %398 = vmatpush3.bf16.msra.mxu1 %v430_v16 }
  0x41   :  { %379 = vmatprep.subr.bf16.mxu0 %v531_v0  ;;  %399 = vmatprep.subr.bf16.mxu1 %v531_v0 }
  0x44   :  { %380 = vmatpush3.bf16.msra.mxu0 %v422_v13  ;;  %400 = vmatpush3.bf16.msra.mxu1 %v431_v17 }
  0x47   :  { %382 = vmatmul.mubr.bf16.vlgmr.msra.gmra.mxu0 %v423_v14 }
 0x107   :  { %v176_v19 = vpop.f32.mrf.mxu0 }
 0x108   :  { %v177_v21 = vadd.f32 %v328_v18, %v176_v19 }
 0x109   :  { %v383_v20 = vpop.f32.mrf.mxu0 }
 0x10a   :  { %v183_v25 = vmax.f32 %v177_v21, 0.0 }
 0x10b   :  { %v179_v22 = vpop.f32.mrf.mxu0 }
 0x10c   :  { %v180_v23 = vadd.f32 %v328_v18, %v179_v22 }
 0x10d   :  { %v384_v24 = vpop.f32.mrf.mxu0 }
 0x10e   :  { %v184_v26 = vmax.f32 %v180_v23, 0.0 }
 0x110   :  { %v185_v27 = vpack.c.bf16 %v184_v26, %v183_v25 }
 0x112   :  { %402 = vmatmul.mubr.bf16.vlgmr.msra.gmra.mxu1 %v185_v27 }
 0x1d2   :  { %v291_v29 = vpop.f32.mrf.mxu1 }
 0x1d3   :  { %v292_v30 = vadd.f32 %v338_v28, %v291_v29 }
 0x1d4   :  { %v403_v31 = vpop.f32.mrf.mxu1 }
 0x1d5   :  { %v298_v32 = vsub.f32 0.0, %v292_v30 }
 0x1d6   :  { %v294_v33 = vpop.f32.mrf.mxu1 }
 0x1d7   :  { %v300_v34 = vmul.f32 1.442695, %v298_v32  ;;  %v295_v35 = vadd.f32 %v338_v28, %v294_v33 }
 0x1d8   :  { %v404_v36 = vpop.f32.mrf.mxu1 }
 0x1d9   :  { %432 = vpow2.f32 %v300_v34  ;;  %v299_v37 = vsub.f32 0.0, %v295_v35 }
 0x1db   :  { %v302_v38 = vmul.f32 1.442695, %v299_v37 }
 0x1dd   :  { %434 = vpow2.f32 %v302_v38 }
 0x1e6   :  { %v433_v39 = vpop.eup %432 }
 0x1e7   :  { %v304_v40 = vadd.f32 1.0, %v433_v39 }
 0x1e9   :  { %436 = vrcp.f32 %v304_v40 }
 0x1ea   :  { %v435_v41 = vpop.eup %434 }
 0x1eb   :  { %v305_v42 = vadd.f32 1.0, %v435_v41 }
 0x1ed   :  { %438 = vrcp.f32 %v305_v42 }
 0x1f6   :  { %v437_v43 = vpop.eup %436 }
 0x1f7   :  { %308 = vst [vmem:[#allocation8] sm:$0xff] %v437_v43 }
 0x1fa   :  { %v439_v44 = vpop.eup %438 }
 0x1fb   :  { %309 = vst [vmem:[#allocation8 + $0x8] sm:$0xff] %v439_v44 }
 0x1fc   :  { %511 = shalt.err (!%p508_p5)
}
 0x1fd   :  { %s534_s12 = smov 128   ;;  %s535_s13 = smov 8  }
 0x1fe   :  { %321 = dma.vmem_to_hbm [thread:$0]  %s316_s4, 256, %s589_s5, [#allocation4], %s534_s12, %s534_s12, %s535_s13  }
 0x1ff   :  { %524 = dma.done.wait [#allocation4], 256  }
 0x200   :  { %525 = vsyncadd [#allocation4], 4294967040 }
 0x201   :  { %325 = vsyncpa [#allocation3], 1 }
 0x202   :  { %326 = vsyncpa [#allocation6], 1 }
 0x203   :  { %327 = vsyncpa [#allocation4], 1 }

</bundles_post_ra>
